<compile_context>
chip_gen: v5e
topology: v5e:2x2
jax: 0.10.0
libtpu: 0.0.40
codegen_flags: <defaults>
</compile_context>

<pallas_src>
import functools

import jax
import jax.numpy as jnp
from jax import lax
from jax.experimental import pallas as pl
from jax.experimental.pallas import tpu as pltpu


_RESIDENT_BUDGET_BYTES = 24 * 1024 * 1024   # whole-operand VMEM residency cap (v7x-safe)
_VMEM_LIMIT_BYTES = 48 * 1024 * 1024        # scoped VMEM limit (fits v5e/v6e/v7x)


# ---------------------------------------------------------------------------
# Kernel 1: out = relu( Â (X W1) + b1 ) · [W2|W3]     grid = (row blocks, K blocks)
# ---------------------------------------------------------------------------
def gcn1_kernel(resident, a_ref, xw1_ref, w23_ref, b1_ref, out_ref, acc_ref):
    k = pl.program_id(1)
    tk = a_ref.shape[1]

    @pl.when(k == 0)
    def _():
        acc_ref[...] = jnp.zeros_like(acc_ref)

    if resident:
        start = pl.multiple_of(k * tk, tk)
        xw1 = xw1_ref[pl.ds(start, tk), :]      # slice the K-stripe of the resident operand
    else:
        xw1 = xw1_ref[...]                      # streamed (k, 0) block
    # bf16 MXU operands, f32 accumulation.
    acc_ref[...] += jnp.dot(a_ref[...], xw1, preferred_element_type=jnp.float32)

    @pl.when(k == pl.num_programs(1) - 1)
    def _():
        h = jnp.maximum(acc_ref[...] + b1_ref[...], 0.0)
        out_ref[...] = jnp.dot(h.astype(jnp.bfloat16), w23_ref[...],
                               preferred_element_type=jnp.float32
                               ).astype(out_ref.dtype)


# ---------------------------------------------------------------------------
# Kernel 2: z = Â (h[W2|W3]) + [b2|b3]  ->  mean + noise * exp(log_std)   (bf16 out)
# ---------------------------------------------------------------------------
def gcn23_kernel(h2p, resident, a_ref, hw23_ref, b23_ref, noise_ref, z_ref, acc_ref):
    k = pl.program_id(1)
    tk = a_ref.shape[1]

    @pl.when(k == 0)
    def _():
        acc_ref[...] = jnp.zeros_like(acc_ref)

    if resident:
        start = pl.multiple_of(k * tk, tk)
        hw23 = hw23_ref[pl.ds(start, tk), :]
    else:
        hw23 = hw23_ref[...]
    acc_ref[...] += jnp.dot(a_ref[...], hw23, preferred_element_type=jnp.float32)

    @pl.when(k == pl.num_programs(1) - 1)
    def _():
        proj = acc_ref[...] + b23_ref[...]
        mean = proj[:, :h2p]
        log_std = proj[:, h2p:]
        z_ref[...] = (mean + noise_ref[...] * jnp.exp(log_std)).astype(z_ref.dtype)


# ---------------------------------------------------------------------------
# Kernel 3: adj_rec[i, j] = sigmoid( z_i z_j^T )     grid = (i blocks, j blocks)
# ---------------------------------------------------------------------------
def decoder_kernel(resident, zi_ref, zall_ref, out_ref):
    if resident:
        j = pl.program_id(1)
        tj = out_ref.shape[1]
        start = pl.multiple_of(j * tj, tj)
        zj = zall_ref[pl.ds(start, tj), :]      # column block sliced from resident z
    else:
        zj = zall_ref[...]
    # Contract the feature dim of BOTH operands — no z.T relayout before the MXU.
    logits = lax.dot_general(zi_ref[...], zj, (((1,), (1,)), ((), ())),
                             preferred_element_type=jnp.float32)
    out_ref[...] = jax.nn.sigmoid(logits)


def _round_up(v, m):
    return (v + m - 1) // m * m


def vgae_forward(a_hat, x, w1, b1, w2, b2, w3, b3, noise, *, tile=256):
    n = x.shape[0]
    h1 = w1.shape[1]
    h2 = w2.shape[1]

    np_ = _round_up(n, tile)     # node dim (row blocks & contraction blocks)
    h1p = _round_up(h1, 128)
    h2p = _round_up(h2, 128)

    f32, bf16 = jnp.float32, jnp.bfloat16

    def pad2(arr, rows, cols, dtype):
        out = jnp.zeros((rows, cols), dtype)
        return out.at[:arr.shape[0], :arr.shape[1]].set(arr.astype(dtype))

    # Reassociation: GraphConv 1 = Â (X W1) + b1.  The tiny (N,F)x(F,H1) GEMM runs
    # once in f32 via XLA; its bf16 result is the K-stationary operand of kernel 1.
    xw1 = jnp.dot(x, w1, preferred_element_type=jnp.float32)

    # Zero padding is exact: padded rows/cols of Â, XW1, W, b, noise contribute 0
    # to every valid output entry; the final result is sliced back to (n, n).
    a_p = pad2(a_hat, np_, np_, bf16)
    xw1_p = pad2(xw1, np_, h1p, bf16)
    b1_p = pad2(b1.reshape(1, -1), 1, h1p, f32)
    # Fuse mean / log_std projections into a single GEMM:  W23 = [W2 | W3].
    w23_p = jnp.concatenate([pad2(w2, h1p, h2p, bf16),
                             pad2(w3, h1p, h2p, bf16)], axis=1)
    b23_p = jnp.concatenate([pad2(b2.reshape(1, -1), 1, h2p, f32),
                             pad2(b3.reshape(1, -1), 1, h2p, f32)], axis=1)
    noise_p = pad2(noise, np_, h2p, f32)

    gm = np_ // tile
    gk = np_ // tile

    cparams_red = pltpu.CompilerParams(
        dimension_semantics=("parallel", "arbitrary"),
        vmem_limit_bytes=_VMEM_LIMIT_BYTES,
    )
    cparams_par = pltpu.CompilerParams(
        dimension_semantics=("parallel", "parallel"),
        vmem_limit_bytes=_VMEM_LIMIT_BYTES,
    )

    def stationary_spec(cols, resident):
        # K-stationary operand: whole-array VMEM residency (constant index_map,
        # sliced in-kernel) when it fits the budget, else stream a (tile, cols)
        # block per K step (previous behavior).
        if resident:
            return pl.BlockSpec((np_, cols), lambda i, k: (0, 0))
        return pl.BlockSpec((tile, cols), lambda i, k: (k, 0))

    xw1_res = np_ * h1p * 2 <= _RESIDENT_BUDGET_BYTES
    hw23_res = np_ * (2 * h2p) * 2 <= _RESIDENT_BUDGET_BYTES
    z_res = np_ * h2p * 2 <= _RESIDENT_BUDGET_BYTES

    # ---- GraphConv 1 (+ fused [W2|W3] projection in the epilogue) -----------
    hw23_p = pl.pallas_call(
        functools.partial(gcn1_kernel, xw1_res),
        out_shape=jax.ShapeDtypeStruct((np_, 2 * h2p), bf16),
        grid_spec=pltpu.PrefetchScalarGridSpec(
            num_scalar_prefetch=0,
            grid=(gm, gk),
            in_specs=[
                pl.BlockSpec((tile, tile), lambda i, k: (i, k)),      # Â stripe
                stationary_spec(h1p, xw1_res),                        # X W1 (resident)
                pl.BlockSpec((h1p, 2 * h2p), lambda i, k: (0, 0)),    # [W2|W3] (resident)
                pl.BlockSpec((1, h1p), lambda i, k: (0, 0)),          # b1 (resident)
            ],
            out_specs=pl.BlockSpec((tile, 2 * h2p), lambda i, k: (i, 0)),
            scratch_shapes=[pltpu.VMEM((tile, h1p), jnp.float32)],
        ),
        compiler_params=cparams_red,
    )(a_p, xw1_p, w23_p, b1_p)

    # ---- GraphConv 2 & 3 (pre-projected) + reparameterization, z in bf16 ----
    z_p = pl.pallas_call(
        functools.partial(gcn23_kernel, h2p, hw23_res),
        out_shape=jax.ShapeDtypeStruct((np_, h2p), bf16),
        grid_spec=pltpu.PrefetchScalarGridSpec(
            num_scalar_prefetch=0,
            grid=(gm, gk),
            in_specs=[
                pl.BlockSpec((tile, tile), lambda i, k: (i, k)),      # Â stripe
                stationary_spec(2 * h2p, hw23_res),                   # h[W2|W3] (resident)
                pl.BlockSpec((1, 2 * h2p), lambda i, k: (0, 0)),      # [b2|b3] (resident)
                pl.BlockSpec((tile, h2p), lambda i, k: (i, 0)),       # noise
            ],
            out_specs=pl.BlockSpec((tile, h2p), lambda i, k: (i, 0)),
            scratch_shapes=[pltpu.VMEM((tile, 2 * h2p), jnp.float32)],
        ),
        compiler_params=cparams_red,
    )(a_p, hw23_p, b23_p, noise_p)

    # ---- Decoder: sigmoid(z z^T), tiled over the (N, N) output --------------
    if z_res:
        zj_spec = pl.BlockSpec((np_, h2p), lambda i, j: (0, 0))       # whole z resident
    else:
        zj_spec = pl.BlockSpec((tile, h2p), lambda i, j: (j, 0))      # streamed fallback

    adj_p = pl.pallas_call(
        functools.partial(decoder_kernel, z_res),
        out_shape=jax.ShapeDtypeStruct((np_, np_), f32),
        grid_spec=pltpu.PrefetchScalarGridSpec(
            num_scalar_prefetch=0,
            grid=(gm, gm),
            in_specs=[
                pl.BlockSpec((tile, h2p), lambda i, j: (i, 0)),       # z row block
                zj_spec,                                              # z column operand
            ],
            out_specs=pl.BlockSpec((tile, tile), lambda i, j: (i, j)),
        ),
        compiler_params=cparams_par,
    )(z_p, z_p)

    return adj_p[:n, :n]


def normalized_adjacency(adj):
    """Â = D^{-1/2} (A + I) D^{-1/2}  (DGL GraphConv norm='both' w/ self-loops)."""
    n = adj.shape[0]
    a = adj + jnp.eye(n, dtype=adj.dtype)
    deg = jnp.sum(a, axis=1)
    d_inv_sqrt = jnp.where(deg > 0, 1.0 / jnp.sqrt(deg), 0.0)
    return a * d_inv_sqrt[:, None] * d_inv_sqrt[None, :]


if __name__ == "__main__":
    # Small, deterministic problem consistent with the module's __init__.
    n_nodes = 8
    in_dim, hidden1_dim, hidden2_dim = 16, 32, 16

    key = jax.random.PRNGKey(0)
    k_adj, k_x, k_w1, k_w2, k_w3, k_noise = jax.random.split(key, 6)

    # Random undirected graph (dense adjacency), then symmetric normalization.
    adj_rand = (jax.random.uniform(k_adj, (n_nodes, n_nodes)) < 0.3).astype(jnp.float32)
    adj = jnp.maximum(adj_rand, adj_rand.T)
    a_hat = normalized_adjacency(adj)

    x = jax.random.normal(k_x, (n_nodes, in_dim), dtype=jnp.float32)

    def glorot(k, shape):
        fan_in, fan_out = shape
        limit = jnp.sqrt(6.0 / (fan_in + fan_out))
        return jax.random.uniform(k, shape, jnp.float32, -limit, limit)

    w1 = glorot(k_w1, (in_dim, hidden1_dim))
    b1 = jnp.zeros((1, hidden1_dim), dtype=jnp.float32)
    w2 = glorot(k_w2, (hidden1_dim, hidden2_dim))
    b2 = jnp.zeros((1, hidden2_dim), dtype=jnp.float32)
    w3 = glorot(k_w3, (hidden1_dim, hidden2_dim))
    b3 = jnp.zeros((1, hidden2_dim), dtype=jnp.float32)

    # Reparameterization noise (torch.randn equivalent), fixed by PRNGKey(0).
    noise = jax.random.normal(k_noise, (n_nodes, hidden2_dim), dtype=jnp.float32)

    adj_rec = vgae_forward(a_hat, x, w1, b1, w2, b2, w3, b3, noise)
    adj_rec = jax.block_until_ready(adj_rec)

    # --- Reference 1: mirrors the kernel's bf16-MXU / f32-accumulate mix -----
    bf = lambda t: t.astype(jnp.bfloat16)
    xw1_f = x @ w1
    ax = jnp.dot(bf(a_hat), bf(xw1_f), preferred_element_type=jnp.float32)
    h_mix = jnp.maximum(ax + b1, 0.0)
    w23 = jnp.concatenate([w2, w3], axis=1)
    b23 = jnp.concatenate([b2, b3], axis=1)
    hw23_mix = jnp.dot(bf(h_mix), bf(w23), preferred_element_type=jnp.float32)
    ahw23 = jnp.dot(bf(a_hat), bf(hw23_mix), preferred_element_type=jnp.float32)
    proj_mix = ahw23 + b23
    mean_mix = proj_mix[:, :hidden2_dim]
    logstd_mix = proj_mix[:, hidden2_dim:]
    z_mix = mean_mix + noise * jnp.exp(logstd_mix)
    z_bf = bf(z_mix)
    logits_mix = lax.dot_general(z_bf, z_bf, (((1,), (1,)), ((), ())),
                                 preferred_element_type=jnp.float32)
    adj_ref_mix = jax.nn.sigmoid(logits_mix)
    assert jnp.allclose(adj_rec, adj_ref_mix, atol=2e-2, rtol=2e-2)

    # --- Reference 2: pure-f32 semantic check (loose: kernel uses bf16 MXU) --
    h_ref = jnp.maximum(a_hat @ x @ w1 + b1, 0.0)
    mean_ref = a_hat @ h_ref @ w2 + b2
    log_std_ref = a_hat @ h_ref @ w3 + b3
    z_ref = mean_ref + noise * jnp.exp(log_std_ref)
    adj_ref = jax.nn.sigmoid(z_ref @ z_ref.T)
    assert jnp.allclose(adj_rec, adj_ref, atol=0.1, rtol=0.1)

    print("KERNEL_OK")
</pallas_src>

<mosaic_0001>
module attributes {stable_mosaic.version = 11 : i64} {
  func.func @gcn1_kernel(%arg0: i32, %arg1: i32, %arg2: memref<256x256xbf16, #tpu.memory_space<vmem>>, %arg3: memref<256x128xbf16, #tpu.memory_space<vmem>>, %arg4: memref<128x256xbf16, #tpu.memory_space<vmem>>, %arg5: memref<1x128xf32, #tpu.memory_space<vmem>>, %arg6: memref<256x256xbf16, #tpu.memory_space<vmem>>, %arg7: memref<256x128xf32, #tpu.memory_space<vmem>>) attributes {dimension_semantics = [#tpu.dimension_semantics<parallel>, #tpu.dimension_semantics<arbitrary>], iteration_bounds = array<i64: 1, 1>, scalar_prefetch = 0 : i64, scratch_operands = 1 : i64, tpu.core_type = #tpu.core_type<tc>, window_params = [{transform_indices = @transform_0, window_bounds = array<i64: 256, 256>}, {pipeline_mode = #tpu.pipeline_mode<synchronous>, transform_indices = @transform_1, window_bounds = array<i64: 256, 128>}, {pipeline_mode = #tpu.pipeline_mode<synchronous>, transform_indices = @transform_2, window_bounds = array<i64: 128, 256>}, {pipeline_mode = #tpu.pipeline_mode<synchronous>, transform_indices = @transform_3, window_bounds = array<i64: 1, 128>}, {transform_indices = @transform_4, window_bounds = array<i64: 256, 256>}]} {
    %c0_i32 = arith.constant 0 : i32
    %0 = arith.cmpi eq, %arg1, %c0_i32 : i32
    %1 = arith.extui %0 : i1 to i32
    %c0_i32_0 = arith.constant 0 : i32
    %2 = arith.cmpi ne, %1, %c0_i32_0 : i32
    scf.if %2 {
      %cst_9 = arith.constant 0.000000e+00 : f32
      %15 = vector.broadcast %cst_9 : f32 to vector<256x128xf32>
      %c0_10 = arith.constant 0 : index
      %c0_11 = arith.constant 0 : index
      %16 = vector.load %arg7[%c0_10, %c0_11] : memref<256x128xf32, #tpu.memory_space<vmem>>, vector<256x128xf32>
      tpu.vector_store %arg7[%c0_10, %c0_11], %15 {strides = array<i32>} : memref<256x128xf32, #tpu.memory_space<vmem>>, vector<256x128xf32>,
    } else {
    }
    %c256_i32 = arith.constant 256 : i32
    %3 = arith.muli %arg1, %c256_i32 : i32
    %4 = tpu.assume_multiple %3, 256 : i32
    %5 = arith.index_cast %4 : i32 to index
    %c0 = arith.constant 0 : index
    %6 = vector.load %arg3[%5, %c0] : memref<256x128xbf16, #tpu.memory_space<vmem>>, vector<256x128xbf16>
    %c0_1 = arith.constant 0 : index
    %c0_2 = arith.constant 0 : index
    %7 = vector.load %arg7[%c0_1, %c0_2] : memref<256x128xf32, #tpu.memory_space<vmem>>, vector<256x128xf32>
    %c0_3 = arith.constant 0 : index
    %c0_4 = arith.constant 0 : index
    %8 = vector.load %arg2[%c0_3, %c0_4] : memref<256x256xbf16, #tpu.memory_space<vmem>>, vector<256x256xbf16>
    %cst = arith.constant dense<0.000000e+00> : vector<256x128xf32>
    %9 = tpu.matmul %8, %6, %cst {dimension_numbers = #tpu.dot_dimension_numbers<[1], [0], [0], [1], [0, 0, 1, 1], [], []>} : vector<256x256xbf16>, vector<256x128xbf16>, vector<256x128xf32> -> vector<256x128xf32>
    %10 = arith.addf %7, %9 : vector<256x128xf32>
    %c0_5 = arith.constant 0 : index
    %c0_6 = arith.constant 0 : index
    %11 = vector.load %arg7[%c0_5, %c0_6] : memref<256x128xf32, #tpu.memory_space<vmem>>, vector<256x128xf32>
    tpu.vector_store %arg7[%c0_5, %c0_6], %10 {strides = array<i32>} : memref<256x128xf32, #tpu.memory_space<vmem>>, vector<256x128xf32>,
    %c0_i32_7 = arith.constant 0 : i32
    %12 = arith.cmpi eq, %arg1, %c0_i32_7 : i32
    %13 = arith.extui %12 : i1 to i32
    %c0_i32_8 = arith.constant 0 : i32
    %14 = arith.cmpi ne, %13, %c0_i32_8 : i32
    scf.if %14 {
      %c0_9 = arith.constant 0 : index
      %c0_10 = arith.constant 0 : index
      %15 = vector.load %arg7[%c0_9, %c0_10] : memref<256x128xf32, #tpu.memory_space<vmem>>, vector<256x128xf32>
      %c0_11 = arith.constant 0 : index
      %c0_12 = arith.constant 0 : index
      %16 = vector.load %arg5[%c0_11, %c0_12] : memref<1x128xf32, #tpu.memory_space<vmem>>, vector<1x128xf32>
      %17 = vector.broadcast %16 : vector<1x128xf32> to vector<256x128xf32>
      %18 = arith.addf %15, %17 : vector<256x128xf32>
      %cst_13 = arith.constant 0.000000e+00 : f32
      %19 = vector.broadcast %cst_13 : f32 to vector<256x128xf32>
      %20 = arith.maximumf %18, %19 : vector<256x128xf32>
      %21 = arith.truncf %20 : vector<256x128xf32> to vector<256x128xbf16>
      %c0_14 = arith.constant 0 : index
      %c0_15 = arith.constant 0 : index
      %22 = vector.load %arg4[%c0_14, %c0_15] : memref<128x256xbf16, #tpu.memory_space<vmem>>, vector<128x256xbf16>
      %cst_16 = arith.constant dense<0.000000e+00> : vector<256x256xf32>
      %23 = tpu.matmul %21, %22, %cst_16 {dimension_numbers = #tpu.dot_dimension_numbers<[1], [0], [0], [1], [0, 0, 1, 1], [], []>} : vector<256x128xbf16>, vector<128x256xbf16>, vector<256x256xf32> -> vector<256x256xf32>
      %24 = arith.truncf %23 : vector<256x256xf32> to vector<256x256xbf16>
      %c0_17 = arith.constant 0 : index
      %c0_18 = arith.constant 0 : index
      %25 = vector.load %arg6[%c0_17, %c0_18] : memref<256x256xbf16, #tpu.memory_space<vmem>>, vector<256x256xbf16>
      tpu.vector_store %arg6[%c0_17, %c0_18], %24 {strides = array<i32>} : memref<256x256xbf16, #tpu.memory_space<vmem>>, vector<256x256xbf16>,
    } else {
    }
    return
  }
  func.func @transform_0(%arg0: i32, %arg1: i32) -> (i32, i32) {
    %c0_i32 = arith.constant 0 : i32
    return %arg0, %arg1 : i32, i32
  }
  func.func @transform_1(%arg0: i32, %arg1: i32) -> (i32, i32) {
    %c0_i32 = arith.constant 0 : i32
    %c0_i32_0 = arith.constant 0 : i32
    %c0_i32_1 = arith.constant 0 : i32
    return %c0_i32, %c0_i32_0 : i32, i32
  }
  func.func @transform_2(%arg0: i32, %arg1: i32) -> (i32, i32) {
    %c0_i32 = arith.constant 0 : i32
    %c0_i32_0 = arith.constant 0 : i32
    %c0_i32_1 = arith.constant 0 : i32
    return %c0_i32, %c0_i32_0 : i32, i32
  }
  func.func @transform_3(%arg0: i32, %arg1: i32) -> (i32, i32) {
    %c0_i32 = arith.constant 0 : i32
    %c0_i32_0 = arith.constant 0 : i32
    %c0_i32_1 = arith.constant 0 : i32
    return %c0_i32, %c0_i32_0 : i32, i32
  }
  func.func @transform_4(%arg0: i32, %arg1: i32) -> (i32, i32) {
    %c0_i32 = arith.constant 0 : i32
    %c0_i32_0 = arith.constant 0 : i32
    return %arg0, %c0_i32 : i32, i32
  }
}

</mosaic_0001>

<bundles_post_ra>
// kernel: tpu_custom_call.1
= control target key start
LH: loop header
LB: loop body
LE: loop exit
PB: predicated region body
PF: predicated region fallthrough
CT: control target
= control target key end

     0   :  { %9 = vsyncpa [#allocation4], 0  ;;  %s1701_s0 = inlined_call_operand.hbm [shape: bf16[256,256], index: 0, kind: input, shape index: {}]   ;;  %s1702_s1 = inlined_call_operand.hbm [shape: bf16[256,128], index: 1, kind: input, shape index: {}]   ;;  %s1703_s2 = inlined_call_operand.hbm [shape: bf16[128,256], index: 2, kind: input, shape index: {}]   ;;  %s1704_s3 = inlined_call_operand.vmem [shape: f32[1,128], index: 3, kind: input, shape index: {}]   ;;  %s1705_s4 = inlined_call_operand.hbm [shape: bf16[256,256], index: 4, kind: output, shape index: {}]  }
   0x1   :  { %10 = vsyncpa [#allocation7], 0  ;;  %s29_s17 = sshll.u32 %s1702_s1, 4  ;;  %s30_s17 = int_to_ptr.hbm [resolvable:$true] %s29_s17 }
   0x2   :  { %11 = vsyncpa [#allocation5], 0  ;;  %s1610_s18 = smov [#allocation6]   ;;  %s16_s22 = sshll.u32 %s1701_s0, 4  ;;  %s17_s22 = int_to_ptr.hbm [resolvable:$true] %s16_s22 }
   0x3   :  { %s31_s19 = sshll.u32 %s1610_s18, 4  ;;  %s1611_s23 = smov 64   ;;  %s32_s19 = int_to_ptr.vmem [resolvable:$true] %s31_s19 }
   0x4   :  { %s1612_s24 = smov 4   ;;  %s1613_s25 = smov [#allocation3]  }
   0x5   :  { %37 = dma.hbm_to_vmem [thread:$0]  %s30_s17, 2048, %s32_s19, [#allocation7], %s1611_s23, %s1611_s23, %s1612_s24  }
   0x6   :  { %s18_s26 = sshll.u32 %s1613_s25, 4  ;;  %s1614_s27 = smov 128   ;;  %s19_s26 = int_to_ptr.vmem [resolvable:$true] %s18_s26 }
   0x7   :  { %s1615_s28 = smov 8   ;;  %s42_s30 = sshll.u32 %s1703_s2, 4  ;;  %s43_s30 = int_to_ptr.hbm [resolvable:$true] %s42_s30 }
   0x8   :  { %24 = dma.hbm_to_vmem [thread:$0]  %s17_s22, 4096, %s19_s26, [#allocation4], %s1614_s27, %s1614_s27, %s1615_s28  }
   0x9   :  { %s1616_s5 = smov [#allocation8]  }
   0xa   :  { %s44_s0 = sshll.u32 %s1616_s5, 4  ;;  %s45_s0 = int_to_ptr.vmem [resolvable:$true] %s44_s0 }
   0xb   :  { %50 = dma.hbm_to_vmem [thread:$0]  %s43_s30, 2048, %s45_s0, [#allocation7], %s1614_s27, %s1614_s27, %s1615_s28  }
   0xc   :  { %1604 = dma.done.wait [#allocation4], 4096  }
   0xd   :  { %1605 = vsyncadd [#allocation4], 4294963200 }
   0xe   :  { %1606 = dma.done.wait [#allocation7], 4096  }
   0xf   :  { %1607 = vsyncadd [#allocation7], 4294963200  ;;  %v1442_v0 = vld [vmem:[#allocation6 + $0x38] sm:$0xff]  ;;  %v1441_v2 = vld [vmem:[#allocation6 + $0x30] sm:$0xff]  ;;  %s1163_s10 = sshll.u32 %s1705_s4, 4  ;;  %s1164_s10 = int_to_ptr.hbm [resolvable:$true] %s1163_s10 }
  0x10   :  { %v1450_v1 = vld [vmem:[#allocation6 + $0x78] sm:$0xff]  ;;  %458 = vmatpush.bf16.msra.mxu0 %v1442_v0  ;;  %v1449_v3 = vld [vmem:[#allocation6 + $0x70] sm:$0xff]  ;;  %v1440_v4 = vld [vmem:[#allocation6 + $0x28] sm:$0xff] }
  0x11   :  { %547 = vmatpush.bf16.msra.mxu1 %v1450_v1  ;;  %v1448_v5 = vld [vmem:[#allocation6 + $0x68] sm:$0xff]  ;;  %v1439_v6 = vld [vmem:[#allocation6 + $0x20] sm:$0xff]  ;;  %v1438_v8 = vld [vmem:[#allocation6 + $0x18] sm:$0xff] }
  0x12   :  { %v1447_v7 = vld [vmem:[#allocation6 + $0x60] sm:$0xff]  ;;  %v1446_v9 = vld [vmem:[#allocation6 + $0x58] sm:$0xff]  ;;  %v1437_v10 = vld [vmem:[#allocation6 + $0x10] sm:$0xff] }
  0x13   :  { %v1445_v11 = vld [vmem:[#allocation6 + $0x50] sm:$0xff]  ;;  %v1436_v12 = vld [vmem:[#allocation6 + $0x8] sm:$0xff]  ;;  %v1435_v14 = vld [vmem:[#allocation6] sm:$0xff] }
  0x14   :  { %459 = vmatpush.bf16.msra.mxu0 %v1441_v2  ;;  %v1444_v13 = vld [vmem:[#allocation6 + $0x48] sm:$0xff]  ;;  %v1443_v15 = vld [vmem:[#allocation6 + $0x40] sm:$0xff]  ;;  %v1189_v22 = vld [vmem:[#allocation3 + $0x10] sm:$0xf] }
  0x15   :  { %548 = vmatpush.bf16.msra.mxu1 %v1449_v3  ;;  %v1181_v16 = vld [vmem:[#allocation3] sm:$0xf]  ;;  %v1452_v17 = vld [vmem:[#allocation3 + $0x4] sm:$0xf0]  ;;  %v1451_v18 = vld [vmem:[#allocation3 + $0x4] sm:$0xf] }
  0x16   :  { %v1183_v19 = vld [vmem:[#allocation3 + $0x8] sm:$0xf0]  ;;  %v1182_v20 = vor.u32 %v1452_v17, %v1181_v16  ;;  %v1454_v23 = vld [vmem:[#allocation3 + $0x14] sm:$0xf0]  ;;  %v1453_v24 = vld [vmem:[#allocation3 + $0x14] sm:$0xf] }
  0x17   :  { %v1186_v21 = vor.u32 %v1451_v18, %v1183_v19  ;;  %v1191_v25 = vld [vmem:[#allocation3 + $0x18] sm:$0xf0]  ;;  %v1190_v26 = vor.u32 %v1454_v23, %v1189_v22  ;;  %v1197_v28 = vld [vmem:[#allocation3 + $0x20] sm:$0xf]  ;;  %v1456_v29 = vld [vmem:[#allocation3 + $0x24] sm:$0xf0] }
  0x18   :  { %460 = vmatpush.bf16.msra.mxu0 %v1440_v4  ;;  %v1194_v27 = vor.u32 %v1453_v24, %v1191_v25  ;;  %v1455_v30 = vld [vmem:[#allocation3 + $0x24] sm:$0xf]  ;;  %v1199_v31 = vld [vmem:[#allocation3 + $0x28] sm:$0xf0]  ;;  %v1198_v32 = vor.u32 %v1456_v29, %v1197_v28  ;;  %v1205_v34 = vld [vmem:[#allocation3 + $0x30] sm:$0xf] }
  0x19   :  { %549 = vmatpush.bf16.msra.mxu1 %v1448_v5  ;;  %v1202_v33 = vor.u32 %v1455_v30, %v1199_v31  ;;  %v1458_v35 = vld [vmem:[#allocation3 + $0x34] sm:$0xf0]  ;;  %v1457_v36 = vld [vmem:[#allocation3 + $0x34] sm:$0xf]  ;;  %v1207_v37 = vld [vmem:[#allocation3 + $0x38] sm:$0xf0] }
  0x1a   :  { %v1206_v38 = vor.u32 %v1458_v35, %v1205_v34  ;;  %v1210_v39 = vor.u32 %v1457_v36, %v1207_v37  ;;  %v1213_v40 = vld [vmem:[#allocation3 + $0x40] sm:$0xf]  ;;  %v1460_v41 = vld [vmem:[#allocation3 + $0x44] sm:$0xf0]  ;;  %v1459_v42 = vld [vmem:[#allocation3 + $0x44] sm:$0xf] }
  0x1b   :  { %v1215_v43 = vld [vmem:[#allocation3 + $0x48] sm:$0xf0]  ;;  %v1214_v44 = vor.u32 %v1460_v41, %v1213_v40  ;;  %v1429_v46 = vld [vmem:[#allocation8 + $0x70] sm:$0xf]  ;;  %v1498_v47 = vld [vmem:[#allocation8 + $0x74] sm:$0xf0] }
  0x1c   :  { %461 = vmatpush.bf16.msra.mxu0 %v1439_v6  ;;  %v1218_v45 = vor.u32 %v1459_v42, %v1215_v43  ;;  %v1497_v48 = vld [vmem:[#allocation8 + $0x74] sm:$0xf]  ;;  %v1430_v49 = vor.u32 %v1498_v47, %v1429_v46  ;;  %v1431_v50 = vld [vmem:[#allocation8 + $0x78] sm:$0xf0]  ;;  %v1221_v52 = vld [vmem:[#allocation3 + $0x50] sm:$0xf] }
  0x1d   :  { %550 = vmatpush.bf16.msra.mxu1 %v1447_v7  ;;  %v1434_v51 = vor.u32 %v1497_v48, %v1431_v50  ;;  %v1462_v53 = vld [vmem:[#allocation3 + $0x54] sm:$0xf0]  ;;  %v1461_v54 = vld [vmem:[#allocation3 + $0x54] sm:$0xf]  ;;  %v1223_v55 = vld [vmem:[#allocation3 + $0x58] sm:$0xf0] }
  0x1e   :  { %915 = vmatpush.bf16.msra.mxu2 %v1430_v49  ;;  %v1222_v56 = vor.u32 %v1462_v53, %v1221_v52  ;;  %v1226_v57 = vor.u32 %v1461_v54, %v1223_v55  ;;  %v1421_v58 = vld [vmem:[#allocation8 + $0x60] sm:$0xf]  ;;  %v1496_v59 = vld [vmem:[#allocation8 + $0x64] sm:$0xf0]  ;;  %v1495_v60 = vld [vmem:[#allocation8 + $0x64] sm:$0xf] }
  0x1f   :  { %1004 = vmatpush.bf16.msra.mxu3 %v1434_v51  ;;  %v1422_v61 = vor.u32 %v1496_v59, %v1421_v58  ;;  %v1423_v62 = vld [vmem:[#allocation8 + $0x68] sm:$0xf0]  ;;  %v1413_v63 = vld [vmem:[#allocation8 + $0x50] sm:$0xf]  ;;  %v1494_v0 = vld [vmem:[#allocation8 + $0x54] sm:$0xf0] }
  0x20   :  { %462 = vmatpush.bf16.msra.mxu0 %v1438_v8  ;;  %v1426_v1 = vor.u32 %v1495_v60, %v1423_v62  ;;  %v1493_v2 = vld [vmem:[#allocation8 + $0x54] sm:$0xf]  ;;  %v1415_v3 = vld [vmem:[#allocation8 + $0x58] sm:$0xf0]  ;;  %v1414_v4 = vor.u32 %v1494_v0, %v1413_v63  ;;  %v1405_v6 = vld [vmem:[#allocation8 + $0x40] sm:$0xf] }
  0x21   :  { %551 = vmatpush.bf16.msra.mxu1 %v1446_v9  ;;  %v1418_v5 = vor.u32 %v1493_v2, %v1415_v3  ;;  %v1492_v7 = vld [vmem:[#allocation8 + $0x44] sm:$0xf0]  ;;  %v1491_v8 = vld [vmem:[#allocation8 + $0x44] sm:$0xf]  ;;  %v1407_v9 = vld [vmem:[#allocation8 + $0x48] sm:$0xf0] }
  0x22   :  { %916 = vmatpush.bf16.msra.mxu2 %v1422_v61  ;;  %v1397_v18 = vld [vmem:[#allocation8 + $0x30] sm:$0xf]  ;;  %v1490_v19 = vld [vmem:[#allocation8 + $0x34] sm:$0xf0]  ;;  %v1399_v22 = vld [vmem:[#allocation8 + $0x38] sm:$0xf0] }
  0x23   :  { %1005 = vmatpush.bf16.msra.mxu3 %v1426_v1  ;;  %v1389_v24 = vld [vmem:[#allocation8 + $0x20] sm:$0xf]  ;;  %v1488_v25 = vld [vmem:[#allocation8 + $0x24] sm:$0xf0]  ;;  %v1391_v28 = vld [vmem:[#allocation8 + $0x28] sm:$0xf0] }
  0x24   :  { %463 = vmatpush.bf16.msra.mxu0 %v1437_v10  ;;  %v1406_v10 = vor.u32 %v1492_v7, %v1405_v6  ;;  %v1381_v30 = vld [vmem:[#allocation8 + $0x10] sm:$0xf]  ;;  %v1486_v31 = vld [vmem:[#allocation8 + $0x14] sm:$0xf0]  ;;  %v1383_v34 = vld [vmem:[#allocation8 + $0x18] sm:$0xf0] }
  0x25   :  { %552 = vmatpush.bf16.msra.mxu1 %v1445_v11  ;;  %v1229_v11 = vld [vmem:[#allocation3 + $0x60] sm:$0xf]  ;;  %v1237_v36 = vld [vmem:[#allocation3 + $0x70] sm:$0xf]  ;;  %v1466_v37 = vld [vmem:[#allocation3 + $0x74] sm:$0xf0] }
  0x26   :  { %917 = vmatpush.bf16.msra.mxu2 %v1414_v4  ;;  %v1483_v40 = vld [vmem:[#allocation8 + $0x4] sm:$0xf]  ;;  %v1465_v41 = vld [vmem:[#allocation3 + $0x74] sm:$0xf]  ;;  %v1239_v42 = vld [vmem:[#allocation3 + $0x78] sm:$0xf0]  ;;  %v1238_v46 = vor.u32 %v1466_v37, %v1237_v36 }
  0x27   :  { %1006 = vmatpush.bf16.msra.mxu3 %v1418_v5  ;;  %v1242_v47 = vor.u32 %v1465_v41, %v1239_v42  ;;  %v1245_v48 = vld [vmem:[#allocation3 + $0x80] sm:$0xf]  ;;  %v1468_v49 = vld [vmem:[#allocation3 + $0x84] sm:$0xf0]  ;;  %v1467_v50 = vld [vmem:[#allocation3 + $0x84] sm:$0xf] }
  0x28   :  { %464 = vmatpush.bf16.msra.mxu0 %v1436_v12  ;;  %v1410_v12 = vor.u32 %v1491_v8, %v1407_v9  ;;  %v1247_v51 = vld [vmem:[#allocation3 + $0x88] sm:$0xf0]  ;;  %v1246_v52 = vor.u32 %v1468_v49, %v1245_v48  ;;  %v1253_v63 = vld [vmem:[#allocation3 + $0x90] sm:$0xf]  ;;  %v1470_v0 = vld [vmem:[#allocation3 + $0x94] sm:$0xf0] }
  0x29   :  { %553 = vmatpush.bf16.msra.mxu1 %v1444_v13  ;;  %v1464_v13 = vld [vmem:[#allocation3 + $0x64] sm:$0xf0]  ;;  %v1250_v53 = vor.u32 %v1467_v50, %v1247_v51  ;;  %v1469_v1 = vld [vmem:[#allocation3 + $0x94] sm:$0xf]  ;;  %v1255_v2 = vld [vmem:[#allocation3 + $0x98] sm:$0xf0]  ;;  %v1254_v6 = vor.u32 %v1470_v0, %v1253_v63 }
  0x2a   :  { %918 = vmatpush.bf16.msra.mxu2 %v1406_v10  ;;  %v1230_v16 = vor.u32 %v1464_v13, %v1229_v11  ;;  %v1258_v7 = vor.u32 %v1469_v1, %v1255_v2  ;;  %v1271_v36 = vld [vmem:[#allocation3 + $0xb8] sm:$0xf0]  ;;  %v1277_v50 = vld [vmem:[#allocation3 + $0xc0] sm:$0xf]  ;;  %v1476_v51 = vld [vmem:[#allocation3 + $0xc4] sm:$0xf0] }
  0x2b   :  { %1007 = vmatpush.bf16.msra.mxu3 %v1410_v12 }
  0x2c   :  { %465 = vmatpush.bf16.msra.mxu0 %v1435_v14  ;;  %v1463_v14 = vld [vmem:[#allocation3 + $0x64] sm:$0xf] }
  0x2d   :  { %554 = vmatpush.bf16.msra.mxu1 %v1443_v15  ;;  %v1231_v15 = vld [vmem:[#allocation3 + $0x68] sm:$0xf0] }
  0x2e   :  { %v1234_v17 = vor.u32 %v1463_v14, %v1231_v15 }
  0x2f   :  { %466 = vmatmul.bf16.vlgmr.msra.gmra.mxu0 %v1182_v20  ;;  %v1489_v20 = vld [vmem:[#allocation8 + $0x34] sm:$0xf] }
  0x30   :  { %555 = vmatmul.bf16.vlgmr.msra.gmra.mxu1 %v1186_v21  ;;  %v1398_v21 = vor.u32 %v1490_v19, %v1397_v18  ;;  %v1402_v23 = vor.u32 %v1489_v20, %v1399_v22  ;;  %v1471_v18 = vld [vmem:[#allocation3 + $0xa4] sm:$0xf]  ;;  %v1263_v19 = vld [vmem:[#allocation3 + $0xa8] sm:$0xf0] }
  0x32   :  { %919 = vmatpush.bf16.msra.mxu2 %v1398_v21  ;;  %1008 = vmatpush.bf16.msra.mxu3 %v1402_v23 }
  0x3f   :  { %471 = vmatmul.bf16.gmra.mxu0 %v1190_v26  ;;  %v1487_v26 = vld [vmem:[#allocation8 + $0x24] sm:$0xf] }
  0x40   :  { %560 = vmatmul.bf16.gmra.mxu1 %v1194_v27  ;;  %v1390_v27 = vor.u32 %v1488_v25, %v1389_v24  ;;  %v1394_v29 = vor.u32 %v1487_v26, %v1391_v28  ;;  %v1266_v24 = vor.u32 %v1471_v18, %v1263_v19 }
  0x42   :  { %920 = vmatpush.bf16.msra.mxu2 %v1390_v27  ;;  %1009 = vmatpush.bf16.msra.mxu3 %v1394_v29 }
  0x4f   :  { %476 = vmatmul.bf16.gmra.mxu0 %v1198_v32  ;;  %v1485_v32 = vld [vmem:[#allocation8 + $0x14] sm:$0xf] }
  0x50   :  { %565 = vmatmul.bf16.gmra.mxu1 %v1202_v33  ;;  %v1382_v33 = vor.u32 %v1486_v31, %v1381_v30  ;;  %v1386_v35 = vor.u32 %v1485_v32, %v1383_v34  ;;  %v1474_v34 = vld [vmem:[#allocation3 + $0xb4] sm:$0xf0] }
  0x52   :  { %921 = vmatpush.bf16.msra.mxu2 %v1382_v33  ;;  %1010 = vmatpush.bf16.msra.mxu3 %v1386_v35  ;;  %v1269_v33 = vld [vmem:[#allocation3 + $0xb0] sm:$0xf]  ;;  %v1473_v35 = vld [vmem:[#allocation3 + $0xb4] sm:$0xf] }
  0x53   :  { %v1274_v41 = vor.u32 %v1473_v35, %v1271_v36 }
  0x5f   :  { %481 = vmatmul.bf16.gmra.mxu0 %v1206_v38  ;;  %v1373_v38 = vld [vmem:[#allocation8] sm:$0xf] }
  0x60   :  { %570 = vmatmul.bf16.gmra.mxu1 %v1210_v39  ;;  %v1484_v39 = vld [vmem:[#allocation8 + $0x4] sm:$0xf0] }
  0x61   :  { %v1374_v43 = vor.u32 %v1484_v39, %v1373_v38 }
  0x63   :  { %922 = vmatpush.bf16.msra.mxu2 %v1374_v43 }
  0x6f   :  { %486 = vmatmul.bf16.gmra.mxu0 %v1214_v44  ;;  %v1375_v44 = vld [vmem:[#allocation8 + $0x8] sm:$0xf0] }
  0x70   :  { %575 = vmatmul.bf16.gmra.mxu1 %v1218_v45  ;;  %v1378_v45 = vor.u32 %v1483_v40, %v1375_v44  ;;  %v1270_v40 = vor.u32 %v1474_v34, %v1269_v33 }
  0x72   :  { %1011 = vmatpush.bf16.msra.mxu3 %v1378_v45 }
  0x7f   :  { %491 = vmatmul.bf16.gmra.mxu0 %v1222_v56 }
  0x80   :  { %580 = vmatmul.bf16.gmra.mxu1 %v1226_v57  ;;  %v1661_v57 = vld [vmem:[%s1704_s3] ss:$0 sm:$0xff]  ;;  %s1617_s3 = smov [#allocation9]  }
  0x81   :  { %s1161_s7 = sshll.u32 %s1617_s3, 4  ;;  %s1162_s7 = int_to_ptr.vmem [resolvable:$true] %s1161_s7 }
  0x8f   :  { %496 = vmatmul.bf16.gmra.mxu0 %v1230_v16  ;;  %v1261_v16 = vld [vmem:[#allocation3 + $0xa0] sm:$0xf] }
  0x90   :  { %585 = vmatmul.bf16.gmra.mxu1 %v1234_v17  ;;  %v1472_v17 = vld [vmem:[#allocation3 + $0xa4] sm:$0xf0] }
  0x91   :  { %v1262_v23 = vor.u32 %v1472_v17, %v1261_v16 }
  0x9f   :  { %501 = vmatmul.bf16.gmra.mxu0 %v1238_v46 }
  0xa0   :  { %590 = vmatmul.bf16.gmra.mxu1 %v1242_v47 }
  0xac   :  { %v467_v54 = vpop.f32.mrf.mxu0 }
  0xad   :  { %v556_v55 = vpop.f32.mrf.mxu1 }
  0xae   :  { %v557_v56 = vadd.f32 %v556_v55, %v467_v54 }
  0xaf   :  { %506 = vmatmul.bf16.gmra.mxu0 %v1246_v52  ;;  %v1475_v52 = vld [vmem:[#allocation3 + $0xc4] sm:$0xf] }
  0xb0   :  { %595 = vmatmul.bf16.gmra.mxu1 %v1250_v53  ;;  %v739_v60 = vadd.f32 %v1661_v57, %v557_v56  ;;  %v1279_v53 = vld [vmem:[#allocation3 + $0xc8] sm:$0xf0] }
  0xb2   :  { %v771_v3 = vmax.f32 %v739_v60, 0.0 }
  0xb4   :  { %v469_v58 = vpop.f32.mrf.mxu0 }
  0xb5   :  { %v558_v59 = vpop.f32.mrf.mxu1 }
  0xb6   :  { %v559_v61 = vadd.f32 %v558_v59, %v469_v58  ;;  %v1278_v58 = vor.u32 %v1476_v51, %v1277_v50  ;;  %v1282_v59 = vor.u32 %v1475_v52, %v1279_v53 }
  0xb8   :  { %v740_v62 = vadd.f32 %v1661_v57, %v559_v61 }
  0xba   :  { %v772_v4 = vmax.f32 %v740_v62, 0.0 }
  0xbc   :  { %v803_v5 = vpack.c.bf16 %v772_v4, %v771_v3  ;;  %v472_v8 = vpop.f32.mrf.mxu0  ;;  %v1285_v4 = vld [vmem:[#allocation3 + $0xd0] sm:$0xf] }
  0xbd   :  { %v561_v9 = vpop.f32.mrf.mxu1 }
  0xbe   :  { %923 = vmatmul.bf16.vlgmr.msra.gmra.mxu2 %v803_v5  ;;  %1012 = vmatmul.bf16.vlgmr.msra.gmra.mxu3 %v803_v5  ;;  %v562_v10 = vadd.f32 %v561_v9, %v472_v8  ;;  %v1478_v5 = vld [vmem:[#allocation3 + $0xd4] sm:$0xf0] }
  0xbf   :  { %511 = vmatmul.bf16.gmra.mxu0 %v1254_v6  ;;  %v1477_v6 = vld [vmem:[#allocation3 + $0xd4] sm:$0xf] }
  0xc0   :  { %600 = vmatmul.bf16.gmra.mxu1 %v1258_v7  ;;  %v741_v13 = vadd.f32 %v1661_v57, %v562_v10  ;;  %v1287_v7 = vld [vmem:[#allocation3 + $0xd8] sm:$0xf0] }
  0xc2   :  { %v773_v20 = vmax.f32 %v741_v13, 0.0 }
  0xc4   :  { %v474_v11 = vpop.f32.mrf.mxu0 }
  0xc5   :  { %v563_v12 = vpop.f32.mrf.mxu1 }
  0xc6   :  { %v564_v14 = vadd.f32 %v563_v12, %v474_v11  ;;  %v1286_v11 = vor.u32 %v1478_v5, %v1285_v4  ;;  %v1290_v12 = vor.u32 %v1477_v6, %v1287_v7 }
  0xc8   :  { %v742_v15 = vadd.f32 %v1661_v57, %v564_v14 }
  0xca   :  { %v774_v21 = vmax.f32 %v742_v15, 0.0 }
  0xcc   :  { %v804_v22 = vpack.c.bf16 %v774_v21, %v773_v20  ;;  %v477_v25 = vpop.f32.mrf.mxu0  ;;  %v1293_v21 = vld [vmem:[#allocation3 + $0xe0] sm:$0xf] }
  0xcd   :  { %v566_v26 = vpop.f32.mrf.mxu1 }
  0xce   :  { %928 = vmatmul.bf16.gmra.mxu2 %v804_v22  ;;  %1017 = vmatmul.bf16.gmra.mxu3 %v804_v22  ;;  %v567_v27 = vadd.f32 %v566_v26, %v477_v25  ;;  %v1480_v22 = vld [vmem:[#allocation3 + $0xe4] sm:$0xf0] }
  0xcf   :  { %516 = vmatmul.bf16.gmra.mxu0 %v1262_v23  ;;  %v1479_v23 = vld [vmem:[#allocation3 + $0xe4] sm:$0xf] }
  0xd0   :  { %605 = vmatmul.bf16.gmra.mxu1 %v1266_v24  ;;  %v743_v30 = vadd.f32 %v1661_v57, %v567_v27  ;;  %v1295_v24 = vld [vmem:[#allocation3 + $0xe8] sm:$0xf0] }
  0xd2   :  { %v775_v37 = vmax.f32 %v743_v30, 0.0 }
  0xd4   :  { %v479_v28 = vpop.f32.mrf.mxu0 }
  0xd5   :  { %v568_v29 = vpop.f32.mrf.mxu1 }
  0xd6   :  { %v569_v31 = vadd.f32 %v568_v29, %v479_v28  ;;  %v1294_v28 = vor.u32 %v1480_v22, %v1293_v21  ;;  %v1298_v29 = vor.u32 %v1479_v23, %v1295_v24 }
  0xd8   :  { %v744_v32 = vadd.f32 %v1661_v57, %v569_v31 }
  0xda   :  { %v776_v38 = vmax.f32 %v744_v32, 0.0 }
  0xdc   :  { %v805_v39 = vpack.c.bf16 %v776_v38, %v775_v37  ;;  %v482_v42 = vpop.f32.mrf.mxu0  ;;  %v1301_v38 = vld [vmem:[#allocation3 + $0xf0] sm:$0xf] }
  0xdd   :  { %v571_v43 = vpop.f32.mrf.mxu1 }
  0xde   :  { %933 = vmatmul.bf16.gmra.mxu2 %v805_v39  ;;  %1022 = vmatmul.bf16.gmra.mxu3 %v805_v39  ;;  %v572_v44 = vadd.f32 %v571_v43, %v482_v42  ;;  %v1482_v39 = vld [vmem:[#allocation3 + $0xf4] sm:$0xf0] }
  0xdf   :  { %521 = vmatmul.bf16.gmra.mxu0 %v1270_v40  ;;  %v1481_v40 = vld [vmem:[#allocation3 + $0xf4] sm:$0xf] }
  0xe0   :  { %610 = vmatmul.bf16.gmra.mxu1 %v1274_v41  ;;  %v745_v47 = vadd.f32 %v1661_v57, %v572_v44  ;;  %v1303_v41 = vld [vmem:[#allocation3 + $0xf8] sm:$0xf0] }
  0xe2   :  { %v777_v54 = vmax.f32 %v745_v47, 0.0 }
  0xe4   :  { %v484_v45 = vpop.f32.mrf.mxu0 }
  0xe5   :  { %v573_v46 = vpop.f32.mrf.mxu1 }
  0xe6   :  { %v574_v48 = vadd.f32 %v573_v46, %v484_v45  ;;  %v1302_v45 = vor.u32 %v1482_v39, %v1301_v38  ;;  %v1306_v46 = vor.u32 %v1481_v40, %v1303_v41 }
  0xe8   :  { %v746_v49 = vadd.f32 %v1661_v57, %v574_v48 }
  0xea   :  { %v778_v55 = vmax.f32 %v746_v49, 0.0 }
  0xec   :  { %v806_v56 = vpack.c.bf16 %v778_v55, %v777_v54  ;;  %v487_v60 = vpop.f32.mrf.mxu0 }
  0xed   :  { %v576_v61 = vpop.f32.mrf.mxu1 }
  0xee   :  { %938 = vmatmul.bf16.gmra.mxu2 %v806_v56  ;;  %1027 = vmatmul.bf16.gmra.mxu3 %v806_v56  ;;  %v577_v62 = vadd.f32 %v576_v61, %v487_v60 }
  0xef   :  { %526 = vmatmul.bf16.gmra.mxu0 %v1278_v58 }
  0xf0   :  { %615 = vmatmul.bf16.gmra.mxu1 %v1282_v59  ;;  %v747_v1 = vadd.f32 %v1661_v57, %v577_v62 }
  0xf2   :  { %v779_v8 = vmax.f32 %v747_v1, 0.0 }
  0xf4   :  { %v489_v63 = vpop.f32.mrf.mxu0 }
  0xf5   :  { %v578_v0 = vpop.f32.mrf.mxu1 }
  0xf6   :  { %v579_v2 = vadd.f32 %v578_v0, %v489_v63 }
  0xf8   :  { %v748_v3 = vadd.f32 %v1661_v57, %v579_v2 }
  0xfa   :  { %v780_v9 = vmax.f32 %v748_v3, 0.0 }
  0xfc   :  { %v807_v10 = vpack.c.bf16 %v780_v9, %v779_v8  ;;  %v492_v13 = vpop.f32.mrf.mxu0 }
  0xfd   :  { %v581_v14 = vpop.f32.mrf.mxu1 }
  0xfe   :  { %943 = vmatmul.bf16.gmra.mxu2 %v807_v10  ;;  %1032 = vmatmul.bf16.gmra.mxu3 %v807_v10  ;;  %v582_v15 = vadd.f32 %v581_v14, %v492_v13 }
  0xff   :  { %531 = vmatmul.bf16.gmra.mxu0 %v1286_v11 }
 0x100   :  { %620 = vmatmul.bf16.gmra.mxu1 %v1290_v12  ;;  %v749_v18 = vadd.f32 %v1661_v57, %v582_v15 }
 0x102   :  { %v781_v25 = vmax.f32 %v749_v18, 0.0 }
 0x104   :  { %v494_v16 = vpop.f32.mrf.mxu0 }
 0x105   :  { %v583_v17 = vpop.f32.mrf.mxu1 }
 0x106   :  { %v584_v19 = vadd.f32 %v583_v17, %v494_v16 }
 0x108   :  { %v750_v20 = vadd.f32 %v1661_v57, %v584_v19 }
 0x10a   :  { %v782_v26 = vmax.f32 %v750_v20, 0.0 }
 0x10c   :  { %v808_v27 = vpack.c.bf16 %v782_v26, %v781_v25  ;;  %v497_v30 = vpop.f32.mrf.mxu0 }
 0x10d   :  { %v586_v31 = vpop.f32.mrf.mxu1 }
 0x10e   :  { %948 = vmatmul.bf16.gmra.mxu2 %v808_v27  ;;  %1037 = vmatmul.bf16.gmra.mxu3 %v808_v27  ;;  %v587_v32 = vadd.f32 %v586_v31, %v497_v30 }
 0x10f   :  { %536 = vmatmul.bf16.gmra.mxu0 %v1294_v28 }
 0x110   :  { %625 = vmatmul.bf16.gmra.mxu1 %v1298_v29  ;;  %v751_v35 = vadd.f32 %v1661_v57, %v587_v32 }
 0x112   :  { %v783_v42 = vmax.f32 %v751_v35, 0.0 }
 0x114   :  { %v499_v33 = vpop.f32.mrf.mxu0 }
 0x115   :  { %v588_v34 = vpop.f32.mrf.mxu1 }
 0x116   :  { %v589_v36 = vadd.f32 %v588_v34, %v499_v33 }
 0x118   :  { %v752_v37 = vadd.f32 %v1661_v57, %v589_v36 }
 0x11a   :  { %v784_v43 = vmax.f32 %v752_v37, 0.0 }
 0x11c   :  { %v809_v44 = vpack.c.bf16 %v784_v43, %v783_v42  ;;  %v502_v47 = vpop.f32.mrf.mxu0 }
 0x11d   :  { %v591_v48 = vpop.f32.mrf.mxu1 }
 0x11e   :  { %953 = vmatmul.bf16.gmra.mxu2 %v809_v44  ;;  %1042 = vmatmul.bf16.gmra.mxu3 %v809_v44  ;;  %v592_v49 = vadd.f32 %v591_v48, %v502_v47 }
 0x11f   :  { %541 = vmatmul.bf16.gmra.mxu0 %v1302_v45 }
 0x120   :  { %630 = vmatmul.bf16.gmra.mxu1 %v1306_v46  ;;  %v753_v52 = vadd.f32 %v1661_v57, %v592_v49 }
 0x122   :  { %v785_v55 = vmax.f32 %v753_v52, 0.0 }
 0x124   :  { %v504_v50 = vpop.f32.mrf.mxu0 }
 0x125   :  { %v593_v51 = vpop.f32.mrf.mxu1 }
 0x126   :  { %v594_v53 = vadd.f32 %v593_v51, %v504_v50 }
 0x128   :  { %v754_v54 = vadd.f32 %v1661_v57, %v594_v53 }
 0x12a   :  { %v786_v56 = vmax.f32 %v754_v54, 0.0 }
 0x12c   :  { %v810_v58 = vpack.c.bf16 %v786_v56, %v785_v55  ;;  %v507_v59 = vpop.f32.mrf.mxu0 }
 0x12d   :  { %v596_v60 = vpop.f32.mrf.mxu1 }
 0x12e   :  { %958 = vmatmul.bf16.gmra.mxu2 %v810_v58  ;;  %1047 = vmatmul.bf16.gmra.mxu3 %v810_v58  ;;  %v597_v61 = vadd.f32 %v596_v60, %v507_v59 }
 0x130   :  { %v755_v0 = vadd.f32 %v1661_v57, %v597_v61 }
 0x132   :  { %v787_v3 = vmax.f32 %v755_v0, 0.0 }
 0x134   :  { %v509_v62 = vpop.f32.mrf.mxu0 }
 0x135   :  { %v598_v63 = vpop.f32.mrf.mxu1 }
 0x136   :  { %v599_v1 = vadd.f32 %v598_v63, %v509_v62 }
 0x138   :  { %v756_v2 = vadd.f32 %v1661_v57, %v599_v1 }
 0x13a   :  { %v788_v4 = vmax.f32 %v756_v2, 0.0 }
 0x13c   :  { %v811_v5 = vpack.c.bf16 %v788_v4, %v787_v3  ;;  %v512_v6 = vpop.f32.mrf.mxu0 }
 0x13d   :  { %v601_v7 = vpop.f32.mrf.mxu1 }
 0x13e   :  { %963 = vmatmul.bf16.gmra.mxu2 %v811_v5  ;;  %1052 = vmatmul.bf16.gmra.mxu3 %v811_v5  ;;  %v602_v10 = vadd.f32 %v601_v7, %v512_v6 }
 0x140   :  { %v757_v14 = vadd.f32 %v1661_v57, %v602_v10 }
 0x141   :  { %v924_v8 = vpop.f32.mrf.mxu2  ;;  %v1013_v9 = vpop.f32.mrf.mxu3 }
 0x142   :  { %v1093_v11 = vpack.c.bf16 %v1013_v9, %v924_v8  ;;  %v789_v19 = vmax.f32 %v757_v14, 0.0 }
 0x144   :  { %1125 = vst [vmem:[#allocation9] sm:$0xff] %v1093_v11  ;;  %v514_v12 = vpop.f32.mrf.mxu0 }
 0x145   :  { %v603_v13 = vpop.f32.mrf.mxu1 }
 0x146   :  { %v604_v15 = vadd.f32 %v603_v13, %v514_v12 }
 0x148   :  { %v758_v16 = vadd.f32 %v1661_v57, %v604_v15 }
 0x149   :  { %v926_v17 = vpop.f32.mrf.mxu2  ;;  %v1015_v18 = vpop.f32.mrf.mxu3 }
 0x14a   :  { %v790_v20 = vmax.f32 %v758_v16, 0.0  ;;  %v1094_v21 = vpack.c.bf16 %v1015_v18, %v926_v17 }
 0x14c   :  { %1126 = vst [vmem:[#allocation9 + $0x8] sm:$0xff] %v1094_v21  ;;  %v812_v22 = vpack.c.bf16 %v790_v20, %v789_v19  ;;  %v517_v23 = vpop.f32.mrf.mxu0 }
 0x14d   :  { %v606_v24 = vpop.f32.mrf.mxu1 }
 0x14e   :  { %968 = vmatmul.bf16.gmra.mxu2 %v812_v22  ;;  %1057 = vmatmul.bf16.gmra.mxu3 %v812_v22  ;;  %v607_v27 = vadd.f32 %v606_v24, %v517_v23 }
 0x150   :  { %v759_v31 = vadd.f32 %v1661_v57, %v607_v27 }
 0x151   :  { %v929_v25 = vpop.f32.mrf.mxu2  ;;  %v1018_v26 = vpop.f32.mrf.mxu3 }
 0x152   :  { %v1095_v28 = vpack.c.bf16 %v1018_v26, %v929_v25  ;;  %v791_v36 = vmax.f32 %v759_v31, 0.0 }
 0x154   :  { %1127 = vst [vmem:[#allocation9 + $0x10] sm:$0xff] %v1095_v28  ;;  %v519_v29 = vpop.f32.mrf.mxu0 }
 0x155   :  { %v608_v30 = vpop.f32.mrf.mxu1 }
 0x156   :  { %v609_v32 = vadd.f32 %v608_v30, %v519_v29 }
 0x158   :  { %v760_v33 = vadd.f32 %v1661_v57, %v609_v32 }
 0x159   :  { %v931_v34 = vpop.f32.mrf.mxu2  ;;  %v1020_v35 = vpop.f32.mrf.mxu3 }
 0x15a   :  { %v792_v37 = vmax.f32 %v760_v33, 0.0  ;;  %v1096_v38 = vpack.c.bf16 %v1020_v35, %v931_v34 }
 0x15c   :  { %1128 = vst [vmem:[#allocation9 + $0x18] sm:$0xff] %v1096_v38  ;;  %v813_v39 = vpack.c.bf16 %v792_v37, %v791_v36  ;;  %v522_v40 = vpop.f32.mrf.mxu0 }
 0x15d   :  { %v611_v41 = vpop.f32.mrf.mxu1 }
 0x15e   :  { %973 = vmatmul.bf16.gmra.mxu2 %v813_v39  ;;  %1062 = vmatmul.bf16.gmra.mxu3 %v813_v39  ;;  %v612_v44 = vadd.f32 %v611_v41, %v522_v40 }
 0x160   :  { %v761_v48 = vadd.f32 %v1661_v57, %v612_v44 }
 0x161   :  { %v934_v42 = vpop.f32.mrf.mxu2  ;;  %v1023_v43 = vpop.f32.mrf.mxu3 }
 0x162   :  { %v1097_v45 = vpack.c.bf16 %v1023_v43, %v934_v42  ;;  %v793_v53 = vmax.f32 %v761_v48, 0.0 }
 0x164   :  { %1129 = vst [vmem:[#allocation9 + $0x20] sm:$0xff] %v1097_v45  ;;  %v524_v46 = vpop.f32.mrf.mxu0 }
 0x165   :  { %v613_v47 = vpop.f32.mrf.mxu1 }
 0x166   :  { %v614_v49 = vadd.f32 %v613_v47, %v524_v46 }
 0x168   :  { %v762_v50 = vadd.f32 %v1661_v57, %v614_v49 }
 0x169   :  { %v936_v51 = vpop.f32.mrf.mxu2  ;;  %v1025_v52 = vpop.f32.mrf.mxu3 }
 0x16a   :  { %v794_v54 = vmax.f32 %v762_v50, 0.0  ;;  %v1098_v55 = vpack.c.bf16 %v1025_v52, %v936_v51 }
 0x16c   :  { %1130 = vst [vmem:[#allocation9 + $0x28] sm:$0xff] %v1098_v55  ;;  %v814_v56 = vpack.c.bf16 %v794_v54, %v793_v53  ;;  %v527_v58 = vpop.f32.mrf.mxu0 }
 0x16d   :  { %v616_v59 = vpop.f32.mrf.mxu1 }
 0x16e   :  { %978 = vmatmul.bf16.gmra.mxu2 %v814_v56  ;;  %1067 = vmatmul.bf16.gmra.mxu3 %v814_v56  ;;  %v617_v62 = vadd.f32 %v616_v59, %v527_v58 }
 0x170   :  { %v763_v2 = vadd.f32 %v1661_v57, %v617_v62 }
 0x171   :  { %v939_v60 = vpop.f32.mrf.mxu2  ;;  %v1028_v61 = vpop.f32.mrf.mxu3 }
 0x172   :  { %v1099_v63 = vpack.c.bf16 %v1028_v61, %v939_v60  ;;  %v795_v7 = vmax.f32 %v763_v2, 0.0 }
 0x174   :  { %1131 = vst [vmem:[#allocation9 + $0x30] sm:$0xff] %v1099_v63  ;;  %v529_v0 = vpop.f32.mrf.mxu0 }
 0x175   :  { %v618_v1 = vpop.f32.mrf.mxu1 }
 0x176   :  { %v619_v3 = vadd.f32 %v618_v1, %v529_v0 }
 0x178   :  { %v764_v4 = vadd.f32 %v1661_v57, %v619_v3 }
 0x179   :  { %v941_v5 = vpop.f32.mrf.mxu2  ;;  %v1030_v6 = vpop.f32.mrf.mxu3 }
 0x17a   :  { %v796_v8 = vmax.f32 %v764_v4, 0.0  ;;  %v1100_v9 = vpack.c.bf16 %v1030_v6, %v941_v5 }
 0x17c   :  { %1132 = vst [vmem:[#allocation9 + $0x38] sm:$0xff] %v1100_v9  ;;  %v815_v10 = vpack.c.bf16 %v796_v8, %v795_v7  ;;  %v532_v11 = vpop.f32.mrf.mxu0 }
 0x17d   :  { %v621_v12 = vpop.f32.mrf.mxu1 }
 0x17e   :  { %983 = vmatmul.bf16.gmra.mxu2 %v815_v10  ;;  %1072 = vmatmul.bf16.gmra.mxu3 %v815_v10  ;;  %v622_v15 = vadd.f32 %v621_v12, %v532_v11 }
 0x180   :  { %v765_v19 = vadd.f32 %v1661_v57, %v622_v15 }
 0x181   :  { %v944_v13 = vpop.f32.mrf.mxu2  ;;  %v1033_v14 = vpop.f32.mrf.mxu3 }
 0x182   :  { %v1101_v16 = vpack.c.bf16 %v1033_v14, %v944_v13  ;;  %v797_v24 = vmax.f32 %v765_v19, 0.0 }
 0x184   :  { %1133 = vst [vmem:[#allocation9 + $0x40] sm:$0xff] %v1101_v16  ;;  %v534_v17 = vpop.f32.mrf.mxu0 }
 0x185   :  { %v623_v18 = vpop.f32.mrf.mxu1 }
 0x186   :  { %v624_v20 = vadd.f32 %v623_v18, %v534_v17 }
 0x188   :  { %v766_v21 = vadd.f32 %v1661_v57, %v624_v20 }
 0x189   :  { %v946_v22 = vpop.f32.mrf.mxu2  ;;  %v1035_v23 = vpop.f32.mrf.mxu3 }
 0x18a   :  { %v798_v25 = vmax.f32 %v766_v21, 0.0  ;;  %v1102_v26 = vpack.c.bf16 %v1035_v23, %v946_v22 }
 0x18c   :  { %1134 = vst [vmem:[#allocation9 + $0x48] sm:$0xff] %v1102_v26  ;;  %v816_v27 = vpack.c.bf16 %v798_v25, %v797_v24  ;;  %v537_v28 = vpop.f32.mrf.mxu0 }
 0x18d   :  { %v626_v29 = vpop.f32.mrf.mxu1 }
 0x18e   :  { %988 = vmatmul.bf16.gmra.mxu2 %v816_v27  ;;  %1077 = vmatmul.bf16.gmra.mxu3 %v816_v27  ;;  %v627_v32 = vadd.f32 %v626_v29, %v537_v28 }
 0x190   :  { %v767_v36 = vadd.f32 %v1661_v57, %v627_v32 }
 0x191   :  { %v949_v30 = vpop.f32.mrf.mxu2  ;;  %v1038_v31 = vpop.f32.mrf.mxu3 }
 0x192   :  { %v1103_v33 = vpack.c.bf16 %v1038_v31, %v949_v30  ;;  %v799_v41 = vmax.f32 %v767_v36, 0.0 }
 0x194   :  { %1135 = vst [vmem:[#allocation9 + $0x50] sm:$0xff] %v1103_v33  ;;  %v539_v34 = vpop.f32.mrf.mxu0 }
 0x195   :  { %v628_v35 = vpop.f32.mrf.mxu1 }
 0x196   :  { %v629_v37 = vadd.f32 %v628_v35, %v539_v34 }
 0x198   :  { %v768_v38 = vadd.f32 %v1661_v57, %v629_v37 }
 0x199   :  { %v951_v39 = vpop.f32.mrf.mxu2  ;;  %v1040_v40 = vpop.f32.mrf.mxu3 }
 0x19a   :  { %v800_v42 = vmax.f32 %v768_v38, 0.0  ;;  %v1104_v43 = vpack.c.bf16 %v1040_v40, %v951_v39 }
 0x19c   :  { %1136 = vst [vmem:[#allocation9 + $0x58] sm:$0xff] %v1104_v43  ;;  %v817_v44 = vpack.c.bf16 %v800_v42, %v799_v41  ;;  %v542_v45 = vpop.f32.mrf.mxu0 }
 0x19d   :  { %v631_v46 = vpop.f32.mrf.mxu1 }
 0x19e   :  { %993 = vmatmul.bf16.gmra.mxu2 %v817_v44  ;;  %1082 = vmatmul.bf16.gmra.mxu3 %v817_v44  ;;  %v632_v49 = vadd.f32 %v631_v46, %v542_v45 }
 0x1a0   :  { %v769_v53 = vadd.f32 %v1661_v57, %v632_v49 }
 0x1a1   :  { %v954_v47 = vpop.f32.mrf.mxu2  ;;  %v1043_v48 = vpop.f32.mrf.mxu3 }
 0x1a2   :  { %v1105_v50 = vpack.c.bf16 %v1043_v48, %v954_v47  ;;  %v801_v59 = vmax.f32 %v769_v53, 0.0 }
 0x1a4   :  { %1137 = vst [vmem:[#allocation9 + $0x60] sm:$0xff] %v1105_v50  ;;  %v544_v51 = vpop.f32.mrf.mxu0 }
 0x1a5   :  { %v633_v52 = vpop.f32.mrf.mxu1 }
 0x1a6   :  { %v634_v54 = vadd.f32 %v633_v52, %v544_v51 }
 0x1a8   :  { %v770_v55 = vadd.f32 %v1661_v57, %v634_v54 }
 0x1a9   :  { %v956_v56 = vpop.f32.mrf.mxu2  ;;  %v1045_v58 = vpop.f32.mrf.mxu3 }
 0x1aa   :  { %v802_v60 = vmax.f32 %v770_v55, 0.0  ;;  %v1106_v61 = vpack.c.bf16 %v1045_v58, %v956_v56 }
 0x1ac   :  { %1138 = vst [vmem:[#allocation9 + $0x68] sm:$0xff] %v1106_v61  ;;  %v818_v62 = vpack.c.bf16 %v802_v60, %v801_v59 }
 0x1ae   :  { %998 = vmatmul.bf16.gmra.mxu2 %v818_v62  ;;  %1087 = vmatmul.bf16.gmra.mxu3 %v818_v62 }
 0x1b1   :  { %v959_v63 = vpop.f32.mrf.mxu2  ;;  %v1048_v0 = vpop.f32.mrf.mxu3 }
 0x1b2   :  { %v1107_v1 = vpack.c.bf16 %v1048_v0, %v959_v63 }
 0x1b4   :  { %1139 = vst [vmem:[#allocation9 + $0x70] sm:$0xff] %v1107_v1 }
 0x1b9   :  { %v961_v2 = vpop.f32.mrf.mxu2  ;;  %v1050_v3 = vpop.f32.mrf.mxu3 }
 0x1ba   :  { %v1108_v4 = vpack.c.bf16 %v1050_v3, %v961_v2 }
 0x1bc   :  { %1140 = vst [vmem:[#allocation9 + $0x78] sm:$0xff] %v1108_v4 }
 0x1c1   :  { %v964_v5 = vpop.f32.mrf.mxu2  ;;  %v1053_v6 = vpop.f32.mrf.mxu3 }
 0x1c2   :  { %v1109_v57 = vpack.c.bf16 %v1053_v6, %v964_v5 }
 0x1c4   :  { %1141 = vst [vmem:[#allocation9 + $0x80] sm:$0xff] %v1109_v57 }
 0x1c9   :  { %v966_v7 = vpop.f32.mrf.mxu2  ;;  %v1055_v8 = vpop.f32.mrf.mxu3 }
 0x1ca   :  { %v1110_v9 = vpack.c.bf16 %v1055_v8, %v966_v7 }
 0x1cc   :  { %1142 = vst [vmem:[#allocation9 + $0x88] sm:$0xff] %v1110_v9 }
 0x1d1   :  { %v969_v10 = vpop.f32.mrf.mxu2  ;;  %v1058_v11 = vpop.f32.mrf.mxu3 }
 0x1d2   :  { %v1111_v12 = vpack.c.bf16 %v1058_v11, %v969_v10 }
 0x1d4   :  { %1143 = vst [vmem:[#allocation9 + $0x90] sm:$0xff] %v1111_v12 }
 0x1d9   :  { %v971_v13 = vpop.f32.mrf.mxu2  ;;  %v1060_v14 = vpop.f32.mrf.mxu3 }
 0x1da   :  { %v1112_v15 = vpack.c.bf16 %v1060_v14, %v971_v13 }
 0x1dc   :  { %1144 = vst [vmem:[#allocation9 + $0x98] sm:$0xff] %v1112_v15 }
 0x1e1   :  { %v974_v16 = vpop.f32.mrf.mxu2  ;;  %v1063_v17 = vpop.f32.mrf.mxu3 }
 0x1e2   :  { %v1113_v18 = vpack.c.bf16 %v1063_v17, %v974_v16 }
 0x1e4   :  { %1145 = vst [vmem:[#allocation9 + $0xa0] sm:$0xff] %v1113_v18 }
 0x1e9   :  { %v976_v19 = vpop.f32.mrf.mxu2  ;;  %v1065_v20 = vpop.f32.mrf.mxu3 }
 0x1ea   :  { %v1114_v21 = vpack.c.bf16 %v1065_v20, %v976_v19 }
 0x1ec   :  { %1146 = vst [vmem:[#allocation9 + $0xa8] sm:$0xff] %v1114_v21 }
 0x1f1   :  { %v979_v22 = vpop.f32.mrf.mxu2  ;;  %v1068_v23 = vpop.f32.mrf.mxu3 }
 0x1f2   :  { %v1115_v24 = vpack.c.bf16 %v1068_v23, %v979_v22 }
 0x1f4   :  { %1147 = vst [vmem:[#allocation9 + $0xb0] sm:$0xff] %v1115_v24 }
 0x1f9   :  { %v981_v25 = vpop.f32.mrf.mxu2  ;;  %v1070_v26 = vpop.f32.mrf.mxu3 }
 0x1fa   :  { %v1116_v27 = vpack.c.bf16 %v1070_v26, %v981_v25 }
 0x1fc   :  { %1148 = vst [vmem:[#allocation9 + $0xb8] sm:$0xff] %v1116_v27 }
 0x201   :  { %v984_v28 = vpop.f32.mrf.mxu2  ;;  %v1073_v29 = vpop.f32.mrf.mxu3 }
 0x202   :  { %v1117_v30 = vpack.c.bf16 %v1073_v29, %v984_v28 }
 0x204   :  { %1149 = vst [vmem:[#allocation9 + $0xc0] sm:$0xff] %v1117_v30 }
 0x209   :  { %v986_v31 = vpop.f32.mrf.mxu2  ;;  %v1075_v32 = vpop.f32.mrf.mxu3 }
 0x20a   :  { %v1118_v33 = vpack.c.bf16 %v1075_v32, %v986_v31 }
 0x20c   :  { %1150 = vst [vmem:[#allocation9 + $0xc8] sm:$0xff] %v1118_v33 }
 0x211   :  { %v989_v34 = vpop.f32.mrf.mxu2  ;;  %v1078_v35 = vpop.f32.mrf.mxu3 }
 0x212   :  { %v1119_v36 = vpack.c.bf16 %v1078_v35, %v989_v34 }
 0x214   :  { %1151 = vst [vmem:[#allocation9 + $0xd0] sm:$0xff] %v1119_v36 }
 0x219   :  { %v991_v37 = vpop.f32.mrf.mxu2  ;;  %v1080_v38 = vpop.f32.mrf.mxu3 }
 0x21a   :  { %v1120_v39 = vpack.c.bf16 %v1080_v38, %v991_v37 }
 0x21c   :  { %1152 = vst [vmem:[#allocation9 + $0xd8] sm:$0xff] %v1120_v39 }
 0x221   :  { %v994_v40 = vpop.f32.mrf.mxu2  ;;  %v1083_v41 = vpop.f32.mrf.mxu3 }
 0x222   :  { %v1121_v42 = vpack.c.bf16 %v1083_v41, %v994_v40 }
 0x224   :  { %1153 = vst [vmem:[#allocation9 + $0xe0] sm:$0xff] %v1121_v42 }
 0x229   :  { %v996_v43 = vpop.f32.mrf.mxu2  ;;  %v1085_v44 = vpop.f32.mrf.mxu3 }
 0x22a   :  { %v1122_v45 = vpack.c.bf16 %v1085_v44, %v996_v43 }
 0x22c   :  { %1154 = vst [vmem:[#allocation9 + $0xe8] sm:$0xff] %v1122_v45 }
 0x231   :  { %v999_v46 = vpop.f32.mrf.mxu2  ;;  %v1088_v47 = vpop.f32.mrf.mxu3 }
 0x232   :  { %v1123_v48 = vpack.c.bf16 %v1088_v47, %v999_v46 }
 0x234   :  { %1155 = vst [vmem:[#allocation9 + $0xf0] sm:$0xff] %v1123_v48 }
 0x239   :  { %v1001_v49 = vpop.f32.mrf.mxu2  ;;  %v1090_v50 = vpop.f32.mrf.mxu3 }
 0x23a   :  { %v1124_v51 = vpack.c.bf16 %v1090_v50, %v1001_v49 }
 0x23c   :  { %1156 = vst [vmem:[#allocation9 + $0xf8] sm:$0xff] %v1124_v51 }
 0x23d   :  { %1169 = dma.vmem_to_hbm [thread:$0]  %s1162_s7, 4096, %s1164_s10, [#allocation5], %s1614_s27, %s1614_s27, %s1615_s28  }
 0x23e   :  { %1608 = dma.done.wait [#allocation5], 4096  }
 0x23f   :  { %1609 = vsyncadd [#allocation5], 4294963200 }
 0x240   :  { %1174 = vsyncpa [#allocation4], 1 }
 0x241   :  { %1175 = vsyncpa [#allocation7], 1 }
 0x242   :  { %1176 = vsyncpa [#allocation5], 1 }

</bundles_post_ra>
